<compile_context>
chip_gen: v7x
topology: tpu7x:2x2x1
jax: 0.10.0
libtpu: 0.0.40
codegen_flags: <defaults>
</compile_context>

<pallas_src>
import functools

import jax
import jax.numpy as jnp
from jax import lax
from jax.experimental import pallas as pl
from jax.experimental.pallas import tpu as pltpu

_LANE = 128
_CHUNK = 256           # inner lane-chunk (256-512 keeps vreg pressure comfortable)
_STATIC_UNROLL_MAX = 8 # <= this many chunks: plain static loop (static lane offsets)


def _round_up(n, m):
    return ((n + m - 1) // m) * m


def _default_hidden_dtype():
    """bf16 hidden math where the VPU supports it (v6e/v7x); f32 elsewhere (v5e/v4)."""
    try:
        kind = jax.devices()[0].device_kind.lower()
    except Exception:
        return jnp.float32
    if "v6" in kind or "v7" in kind:
        return jnp.bfloat16
    return jnp.float32


def _build_kernel(H, chunk, n_chunks, hidden_dtype):
    cdt = hidden_dtype

    def kernel(x_ref, w1_ref, b1_ref, w2_ref, b2_ref, o_ref):
        # x_ref : [2, bl] (source dtype)   w1_ref: [50, 2]   b1_ref: [50, 1]
        # w2_ref: [50, 1]                  b2_ref: [1, 1]    o_ref : [1, bl] f32
        #
        # Hoisted, loop-invariant values (computed once per block).  JAX does not CSE
        # broadcast_in_dim, so the weight-side lane-broadcasts are materialized here instead of
        # once per chunk; mild vreg pressure is cheaper than re-broadcasting on the VALU slot.
        w1 = w1_ref[...].astype(cdt)                              # [H, 2]
        w1b0 = jnp.broadcast_to(w1[:, 0:1], (H, chunk))           # [H, chunk]
        w1b1 = jnp.broadcast_to(w1[:, 1:2], (H, chunk))
        b1b = jnp.broadcast_to(b1_ref[...].astype(cdt), (H, chunk))
        w2b = jnp.broadcast_to(w2_ref[...].astype(cdt), (H, chunk))
        b2v = b2_ref[...]                                         # [1, 1] f32

        def do_chunk(c):
            off = c * chunk
            if not isinstance(off, int):
                off = pl.multiple_of(off, chunk)                  # aligned dynamic lane offset
            xc = x_ref[:, pl.ds(off, chunk)].astype(cdt)          # [2, chunk] (cast in-kernel)
            x0 = xc[0:1, :]
            x1 = xc[1:2, :]
            # Layer 1 (K=2): broadcast FMAs on the VPU; MXU is deliberately skipped.
            h = jnp.maximum(w1b0 * x0 + w1b1 * x1 + b1b, 0)
            # Layer 2 (N=1): elementwise mul + sublane (XLU) reduce, f32 accumulation.
            z = jnp.sum(h * w2b, axis=0, keepdims=True, dtype=jnp.float32) + b2v
            # Numerically stable sigmoid; exp + approx reciprocal both ride the EUP slot.
            ez = jnp.exp(-jnp.abs(z))
            inv = pl.reciprocal(1.0 + ez, approx=True)
            o_ref[:, pl.ds(off, chunk)] = jnp.where(z >= 0.0, inv, ez * inv)

        if n_chunks <= _STATIC_UNROLL_MAX:
            for c in range(n_chunks):          # fully static lane offsets
                do_chunk(c)
        else:
            def body(c, carry):
                do_chunk(c)
                return carry
            lax.fori_loop(0, n_chunks, body, 0, unroll=_STATIC_UNROLL_MAX)

    return kernel


@functools.partial(jax.jit,
                   static_argnames=("batch_tile", "hidden_dtype", "feature_major"))
def binary_classifier_forward(x, w1, b1, w2, b2, *, batch_tile=65536,
                              hidden_dtype=None, feature_major=False):
    """Forward pass of BinaryClassifier.

    x : [B, 2] (module interface) or [2, B] if feature_major=True (preferred: avoids an
        extra HBM transpose pass).
    w1: [50, 2] (fc1.weight)   b1: [50] (fc1.bias)
    w2: [1, 50] (fc2.weight)   b2: [1]  (fc2.bias)
    returns [B, 1] float32 sigmoid probabilities.
    """
    if hidden_dtype is None:
        hidden_dtype = _default_hidden_dtype()

    # Mirror `x.float()` for non-fp inputs; keep f32/bf16 in their source dtype through the
    # (optional) transpose and cast inside the kernel instead.
    if x.dtype not in (jnp.float32, jnp.bfloat16):
        x = x.astype(jnp.float32)
    x_fm = x if feature_major else x.T           # fallback path: one extra HBM pass

    F, B = x_fm.shape
    H = w1.shape[0]
    assert F == 2 and w1.shape == (H, F), "BinaryClassifier expects 2 input features"

    w1f = w1.astype(jnp.float32)
    b1c = b1.astype(jnp.float32).reshape(H, 1)
    w2c = w2.astype(jnp.float32).reshape(H, 1)   # [1, 50] -> [50, 1]
    b2c = b2.astype(jnp.float32).reshape(1, 1)

    # --- batch tile selection (lanes) ---
    B_lanes = _round_up(B, _LANE)
    bl = min(max(int(batch_tile), 1), B_lanes)
    # Keep >= 4 grid steps on large batches so v7x megacore can shard the parallel axis.
    if B_lanes >= 4 * 1024:
        bl = min(bl, _round_up((B_lanes + 3) // 4, _LANE))
    chunk = min(_CHUNK, _round_up(bl, _LANE))
    bl = _round_up(bl, chunk)
    n_chunks = bl // chunk
    # VMEM footprint ~128 B/lane double-buffered: default bl=65536 ~ 8 MiB, fits every chip's
    # scoped default (v5e 16 MiB, v6e/v7x 32 MiB); keep batch_tile <= ~128K on v5e.

    grid = (pl.cdiv(B, bl),)                     # ragged last block handled by Pallas masking
    cost = pl.CostEstimate(
        flops=360 * B,
        transcendentals=2 * B,
        bytes_accessed=F * B * x_fm.dtype.itemsize + 4 * B + (H * F + 2 * H + 1) * 4,
    )

    out = pl.pallas_call(
        _build_kernel(H, chunk, n_chunks, hidden_dtype),
        out_shape=jax.ShapeDtypeStruct((1, B), jnp.float32),
        grid=grid,
        in_specs=[
            pl.BlockSpec((F, bl), lambda i: (0, i)),   # x tile: streamed over the batch
            pl.BlockSpec((H, F), lambda i: (0, 0)),    # w1: resident across grid steps
            pl.BlockSpec((H, 1), lambda i: (0, 0)),    # b1: resident
            pl.BlockSpec((H, 1), lambda i: (0, 0)),    # w2: resident
            pl.BlockSpec((1, 1), lambda i: (0, 0)),    # b2: resident
        ],
        out_specs=pl.BlockSpec((1, bl), lambda i: (0, i)),
        compiler_params=pltpu.CompilerParams(
            dimension_semantics=("parallel",),          # megacore sharding on v7x
        ),
        cost_estimate=cost,
    )(x_fm, w1f, b1c, w2c, b2c)

    # [1, B] -> [B, 1] to match the nn.Module convention.
    return out.reshape(-1, 1)


def init_params(key):
    # Deterministic init matching nn.Linear shapes:
    #   fc1.weight [50, 2], fc1.bias [50]; fc2.weight [1, 50], fc2.bias [1]
    k1, k2, k3, k4 = jax.random.split(key, 4)
    bound1 = 1.0 / jnp.sqrt(2.0)
    bound2 = 1.0 / jnp.sqrt(50.0)
    w1 = jax.random.uniform(k1, (50, 2), jnp.float32, -bound1, bound1)
    b1 = jax.random.uniform(k2, (50,), jnp.float32, -bound1, bound1)
    w2 = jax.random.uniform(k3, (1, 50), jnp.float32, -bound2, bound2)
    b2 = jax.random.uniform(k4, (1,), jnp.float32, -bound2, bound2)
    return w1, b1, w2, b2


if __name__ == "__main__":
    key = jax.random.PRNGKey(0)
    k_params, k_x = jax.random.split(key)
    w1, b1, w2, b2 = init_params(k_params)

    # Small batch; deliberately NOT a multiple of 128 so the ragged (masked) last block and
    # the multi-chunk inner loop are exercised.
    B = 1000
    x = jax.random.normal(k_x, (B, 2), dtype=jnp.float32)

    # Pure-JAX reference of the same forward pass (fc1/fc2 in PyTorch layout).
    ref = jax.nn.sigmoid(jnp.maximum(x @ w1.T + b1, 0.0) @ w2.T + b2)

    # 1) f32 hidden math: tight parity with the reference.
    out_f32 = jax.block_until_ready(
        binary_classifier_forward(x, w1, b1, w2, b2, hidden_dtype=jnp.float32))
    assert out_f32.shape == (B, 1)
    assert jnp.allclose(out_f32, ref, atol=5e-3, rtol=5e-3), \
        float(jnp.max(jnp.abs(out_f32 - ref)))

    # 2) Default path (bf16 hidden math on v6e/v7x, f32 elsewhere): looser sanity bound.
    out_def = jax.block_until_ready(binary_classifier_forward(x, w1, b1, w2, b2))
    assert out_def.shape == (B, 1)
    assert jnp.allclose(out_def, ref, atol=3e-2, rtol=3e-2), \
        float(jnp.max(jnp.abs(out_def - ref)))

    # 3) Preferred feature-major interface ([2, B] input) matches the fallback path.
    out_fm = jax.block_until_ready(
        binary_classifier_forward(x.T, w1, b1, w2, b2, feature_major=True))
    assert jnp.allclose(out_fm, out_def, atol=1e-6, rtol=0.0)

    print("KERNEL_OK")
</pallas_src>

<mosaic_0001>
module attributes {stable_mosaic.version = 11 : i64} {
  func.func @kernel(%arg0: i32, %arg1: memref<2x1024xf32, #tpu.memory_space<vmem>>, %arg2: memref<50x2xf32, #tpu.memory_space<vmem>>, %arg3: memref<50x1xf32, #tpu.memory_space<vmem>>, %arg4: memref<50x1xf32, #tpu.memory_space<vmem>>, %arg5: memref<1x1xf32, #tpu.memory_space<vmem>>, %arg6: memref<1x1024xf32, #tpu.memory_space<vmem>>) attributes {dimension_semantics = [#tpu.dimension_semantics<parallel>], iteration_bounds = array<i64: 1>, scalar_prefetch = 0 : i64, scratch_operands = 0 : i64, tpu.core_type = #tpu.core_type<tc>, window_params = [{transform_indices = @transform_0, window_bounds = array<i64: 2, 1024>}, {pipeline_mode = #tpu.pipeline_mode<synchronous>, transform_indices = @transform_1, window_bounds = array<i64: 50, 2>}, {pipeline_mode = #tpu.pipeline_mode<synchronous>, transform_indices = @transform_2, window_bounds = array<i64: 50, 1>}, {pipeline_mode = #tpu.pipeline_mode<synchronous>, transform_indices = @transform_3, window_bounds = array<i64: 50, 1>}, {pipeline_mode = #tpu.pipeline_mode<synchronous>, transform_indices = @transform_4, window_bounds = array<i64: 1, 1>}, {transform_indices = @transform_5, window_bounds = array<i64: 1, 1024>}]} {
    %c0 = arith.constant 0 : index
    %c0_0 = arith.constant 0 : index
    %0 = vector.load %arg2[%c0, %c0_0] : memref<50x2xf32, #tpu.memory_space<vmem>>, vector<50x2xf32>
    %1 = vector.extract_strided_slice %0 {offsets = [0, 0], sizes = [50, 1], strides = [1, 1]} : vector<50x2xf32> to vector<50x1xf32>
    %2 = vector.shape_cast %1 : vector<50x1xf32> to vector<50x1xf32>
    %3 = vector.broadcast %2 : vector<50x1xf32> to vector<50x256xf32>
    %4 = vector.extract_strided_slice %0 {offsets = [0, 1], sizes = [50, 1], strides = [1, 1]} : vector<50x2xf32> to vector<50x1xf32>
    %5 = vector.shape_cast %4 : vector<50x1xf32> to vector<50x1xf32>
    %6 = vector.broadcast %5 : vector<50x1xf32> to vector<50x256xf32>
    %c0_1 = arith.constant 0 : index
    %c0_2 = arith.constant 0 : index
    %7 = vector.load %arg3[%c0_1, %c0_2] : memref<50x1xf32, #tpu.memory_space<vmem>>, vector<50x1xf32>
    %8 = vector.shape_cast %7 : vector<50x1xf32> to vector<50x1xf32>
    %9 = vector.broadcast %8 : vector<50x1xf32> to vector<50x256xf32>
    %c0_3 = arith.constant 0 : index
    %c0_4 = arith.constant 0 : index
    %10 = vector.load %arg4[%c0_3, %c0_4] : memref<50x1xf32, #tpu.memory_space<vmem>>, vector<50x1xf32>
    %11 = vector.shape_cast %10 : vector<50x1xf32> to vector<50x1xf32>
    %12 = vector.broadcast %11 : vector<50x1xf32> to vector<50x256xf32>
    %c0_5 = arith.constant 0 : index
    %c0_6 = arith.constant 0 : index
    %13 = vector.load %arg5[%c0_5, %c0_6] : memref<1x1xf32, #tpu.memory_space<vmem>>, vector<1x1xf32>
    %c0_7 = arith.constant 0 : index
    %c0_8 = arith.constant 0 : index
    %14 = vector.load %arg1[%c0_7, %c0_8] : memref<2x1024xf32, #tpu.memory_space<vmem>>, vector<2x256xf32>
    %15 = vector.extract_strided_slice %14 {offsets = [0, 0], sizes = [1, 256], strides = [1, 1]} : vector<2x256xf32> to vector<1x256xf32>
    %16 = vector.extract_strided_slice %14 {offsets = [1, 0], sizes = [1, 256], strides = [1, 1]} : vector<2x256xf32> to vector<1x256xf32>
    %17 = vector.broadcast %15 : vector<1x256xf32> to vector<50x256xf32>
    %18 = arith.mulf %3, %17 : vector<50x256xf32>
    %19 = vector.broadcast %16 : vector<1x256xf32> to vector<50x256xf32>
    %20 = arith.mulf %6, %19 : vector<50x256xf32>
    %21 = arith.addf %18, %20 : vector<50x256xf32>
    %22 = arith.addf %21, %9 : vector<50x256xf32>
    %cst = arith.constant 0.000000e+00 : f32
    %23 = vector.broadcast %cst : f32 to vector<50x256xf32>
    %24 = arith.maximumf %22, %23 : vector<50x256xf32>
    %25 = arith.mulf %24, %12 : vector<50x256xf32>
    %cst_9 = arith.constant dense<0.000000e+00> : vector<256xf32>
    %26 = vector.multi_reduction <add>, %25, %cst_9 [0] : vector<50x256xf32> to vector<256xf32>
    %27 = vector.shape_cast %26 : vector<256xf32> to vector<1x256xf32>
    %28 = vector.broadcast %13 : vector<1x1xf32> to vector<1x256xf32>
    %29 = arith.addf %27, %28 : vector<1x256xf32>
    %30 = math.absf %29 : vector<1x256xf32>
    %cst_10 = arith.constant 0.000000e+00 : f32
    %31 = vector.broadcast %cst_10 : f32 to vector<1x256xf32>
    %32 = arith.subf %31, %30 : vector<1x256xf32>
    %33 = math.exp %32 : vector<1x256xf32>
    %cst_11 = arith.constant 1.000000e+00 : f32
    %34 = vector.broadcast %cst_11 : f32 to vector<1x256xf32>
    %35 = arith.addf %34, %33 : vector<1x256xf32>
    %36 = tpu.reciprocal %35 {approx = true} : vector<1x256xf32> -> vector<1x256xf32>
    %cst_12 = arith.constant 0.000000e+00 : f32
    %37 = vector.broadcast %cst_12 : f32 to vector<1x256xf32>
    %38 = arith.cmpf oge, %29, %37 : vector<1x256xf32>
    %39 = arith.mulf %33, %36 : vector<1x256xf32>
    %40 = arith.select %38, %36, %39 : vector<1x256xi1>, vector<1x256xf32>
    %c0_13 = arith.constant 0 : index
    %c0_14 = arith.constant 0 : index
    %41 = vector.load %arg6[%c0_13, %c0_14] : memref<1x1024xf32, #tpu.memory_space<vmem>>, vector<1x256xf32>
    tpu.vector_store %arg6[%c0_13, %c0_14], %40 {strides = array<i32>} : memref<1x1024xf32, #tpu.memory_space<vmem>>, vector<1x256xf32>,
    %c0_15 = arith.constant 0 : index
    %c256 = arith.constant 256 : index
    %42 = vector.load %arg1[%c0_15, %c256] : memref<2x1024xf32, #tpu.memory_space<vmem>>, vector<2x256xf32>
    %43 = vector.extract_strided_slice %42 {offsets = [0, 0], sizes = [1, 256], strides = [1, 1]} : vector<2x256xf32> to vector<1x256xf32>
    %44 = vector.extract_strided_slice %42 {offsets = [1, 0], sizes = [1, 256], strides = [1, 1]} : vector<2x256xf32> to vector<1x256xf32>
    %45 = vector.broadcast %43 : vector<1x256xf32> to vector<50x256xf32>
    %46 = arith.mulf %3, %45 : vector<50x256xf32>
    %47 = vector.broadcast %44 : vector<1x256xf32> to vector<50x256xf32>
    %48 = arith.mulf %6, %47 : vector<50x256xf32>
    %49 = arith.addf %46, %48 : vector<50x256xf32>
    %50 = arith.addf %49, %9 : vector<50x256xf32>
    %cst_16 = arith.constant 0.000000e+00 : f32
    %51 = vector.broadcast %cst_16 : f32 to vector<50x256xf32>
    %52 = arith.maximumf %50, %51 : vector<50x256xf32>
    %53 = arith.mulf %52, %12 : vector<50x256xf32>
    %cst_17 = arith.constant dense<0.000000e+00> : vector<256xf32>
    %54 = vector.multi_reduction <add>, %53, %cst_17 [0] : vector<50x256xf32> to vector<256xf32>
    %55 = vector.shape_cast %54 : vector<256xf32> to vector<1x256xf32>
    %56 = vector.broadcast %13 : vector<1x1xf32> to vector<1x256xf32>
    %57 = arith.addf %55, %56 : vector<1x256xf32>
    %58 = math.absf %57 : vector<1x256xf32>
    %cst_18 = arith.constant 0.000000e+00 : f32
    %59 = vector.broadcast %cst_18 : f32 to vector<1x256xf32>
    %60 = arith.subf %59, %58 : vector<1x256xf32>
    %61 = math.exp %60 : vector<1x256xf32>
    %cst_19 = arith.constant 1.000000e+00 : f32
    %62 = vector.broadcast %cst_19 : f32 to vector<1x256xf32>
    %63 = arith.addf %62, %61 : vector<1x256xf32>
    %64 = tpu.reciprocal %63 {approx = true} : vector<1x256xf32> -> vector<1x256xf32>
    %cst_20 = arith.constant 0.000000e+00 : f32
    %65 = vector.broadcast %cst_20 : f32 to vector<1x256xf32>
    %66 = arith.cmpf oge, %57, %65 : vector<1x256xf32>
    %67 = arith.mulf %61, %64 : vector<1x256xf32>
    %68 = arith.select %66, %64, %67 : vector<1x256xi1>, vector<1x256xf32>
    %c0_21 = arith.constant 0 : index
    %c256_22 = arith.constant 256 : index
    %69 = vector.load %arg6[%c0_21, %c256_22] : memref<1x1024xf32, #tpu.memory_space<vmem>>, vector<1x256xf32>
    tpu.vector_store %arg6[%c0_21, %c256_22], %68 {strides = array<i32>} : memref<1x1024xf32, #tpu.memory_space<vmem>>, vector<1x256xf32>,
    %c0_23 = arith.constant 0 : index
    %c512 = arith.constant 512 : index
    %70 = vector.load %arg1[%c0_23, %c512] : memref<2x1024xf32, #tpu.memory_space<vmem>>, vector<2x256xf32>
    %71 = vector.extract_strided_slice %70 {offsets = [0, 0], sizes = [1, 256], strides = [1, 1]} : vector<2x256xf32> to vector<1x256xf32>
    %72 = vector.extract_strided_slice %70 {offsets = [1, 0], sizes = [1, 256], strides = [1, 1]} : vector<2x256xf32> to vector<1x256xf32>
    %73 = vector.broadcast %71 : vector<1x256xf32> to vector<50x256xf32>
    %74 = arith.mulf %3, %73 : vector<50x256xf32>
    %75 = vector.broadcast %72 : vector<1x256xf32> to vector<50x256xf32>
    %76 = arith.mulf %6, %75 : vector<50x256xf32>
    %77 = arith.addf %74, %76 : vector<50x256xf32>
    %78 = arith.addf %77, %9 : vector<50x256xf32>
    %cst_24 = arith.constant 0.000000e+00 : f32
    %79 = vector.broadcast %cst_24 : f32 to vector<50x256xf32>
    %80 = arith.maximumf %78, %79 : vector<50x256xf32>
    %81 = arith.mulf %80, %12 : vector<50x256xf32>
    %cst_25 = arith.constant dense<0.000000e+00> : vector<256xf32>
    %82 = vector.multi_reduction <add>, %81, %cst_25 [0] : vector<50x256xf32> to vector<256xf32>
    %83 = vector.shape_cast %82 : vector<256xf32> to vector<1x256xf32>
    %84 = vector.broadcast %13 : vector<1x1xf32> to vector<1x256xf32>
    %85 = arith.addf %83, %84 : vector<1x256xf32>
    %86 = math.absf %85 : vector<1x256xf32>
    %cst_26 = arith.constant 0.000000e+00 : f32
    %87 = vector.broadcast %cst_26 : f32 to vector<1x256xf32>
    %88 = arith.subf %87, %86 : vector<1x256xf32>
    %89 = math.exp %88 : vector<1x256xf32>
    %cst_27 = arith.constant 1.000000e+00 : f32
    %90 = vector.broadcast %cst_27 : f32 to vector<1x256xf32>
    %91 = arith.addf %90, %89 : vector<1x256xf32>
    %92 = tpu.reciprocal %91 {approx = true} : vector<1x256xf32> -> vector<1x256xf32>
    %cst_28 = arith.constant 0.000000e+00 : f32
    %93 = vector.broadcast %cst_28 : f32 to vector<1x256xf32>
    %94 = arith.cmpf oge, %85, %93 : vector<1x256xf32>
    %95 = arith.mulf %89, %92 : vector<1x256xf32>
    %96 = arith.select %94, %92, %95 : vector<1x256xi1>, vector<1x256xf32>
    %c0_29 = arith.constant 0 : index
    %c512_30 = arith.constant 512 : index
    %97 = vector.load %arg6[%c0_29, %c512_30] : memref<1x1024xf32, #tpu.memory_space<vmem>>, vector<1x256xf32>
    tpu.vector_store %arg6[%c0_29, %c512_30], %96 {strides = array<i32>} : memref<1x1024xf32, #tpu.memory_space<vmem>>, vector<1x256xf32>,
    %c0_31 = arith.constant 0 : index
    %c768 = arith.constant 768 : index
    %98 = vector.load %arg1[%c0_31, %c768] : memref<2x1024xf32, #tpu.memory_space<vmem>>, vector<2x256xf32>
    %99 = vector.extract_strided_slice %98 {offsets = [0, 0], sizes = [1, 256], strides = [1, 1]} : vector<2x256xf32> to vector<1x256xf32>
    %100 = vector.extract_strided_slice %98 {offsets = [1, 0], sizes = [1, 256], strides = [1, 1]} : vector<2x256xf32> to vector<1x256xf32>
    %101 = vector.broadcast %99 : vector<1x256xf32> to vector<50x256xf32>
    %102 = arith.mulf %3, %101 : vector<50x256xf32>
    %103 = vector.broadcast %100 : vector<1x256xf32> to vector<50x256xf32>
    %104 = arith.mulf %6, %103 : vector<50x256xf32>
    %105 = arith.addf %102, %104 : vector<50x256xf32>
    %106 = arith.addf %105, %9 : vector<50x256xf32>
    %cst_32 = arith.constant 0.000000e+00 : f32
    %107 = vector.broadcast %cst_32 : f32 to vector<50x256xf32>
    %108 = arith.maximumf %106, %107 : vector<50x256xf32>
    %109 = arith.mulf %108, %12 : vector<50x256xf32>
    %cst_33 = arith.constant dense<0.000000e+00> : vector<256xf32>
    %110 = vector.multi_reduction <add>, %109, %cst_33 [0] : vector<50x256xf32> to vector<256xf32>
    %111 = vector.shape_cast %110 : vector<256xf32> to vector<1x256xf32>
    %112 = vector.broadcast %13 : vector<1x1xf32> to vector<1x256xf32>
    %113 = arith.addf %111, %112 : vector<1x256xf32>
    %114 = math.absf %113 : vector<1x256xf32>
    %cst_34 = arith.constant 0.000000e+00 : f32
    %115 = vector.broadcast %cst_34 : f32 to vector<1x256xf32>
    %116 = arith.subf %115, %114 : vector<1x256xf32>
    %117 = math.exp %116 : vector<1x256xf32>
    %cst_35 = arith.constant 1.000000e+00 : f32
    %118 = vector.broadcast %cst_35 : f32 to vector<1x256xf32>
    %119 = arith.addf %118, %117 : vector<1x256xf32>
    %120 = tpu.reciprocal %119 {approx = true} : vector<1x256xf32> -> vector<1x256xf32>
    %cst_36 = arith.constant 0.000000e+00 : f32
    %121 = vector.broadcast %cst_36 : f32 to vector<1x256xf32>
    %122 = arith.cmpf oge, %113, %121 : vector<1x256xf32>
    %123 = arith.mulf %117, %120 : vector<1x256xf32>
    %124 = arith.select %122, %120, %123 : vector<1x256xi1>, vector<1x256xf32>
    %c0_37 = arith.constant 0 : index
    %c768_38 = arith.constant 768 : index
    %125 = vector.load %arg6[%c0_37, %c768_38] : memref<1x1024xf32, #tpu.memory_space<vmem>>, vector<1x256xf32>
    tpu.vector_store %arg6[%c0_37, %c768_38], %124 {strides = array<i32>} : memref<1x1024xf32, #tpu.memory_space<vmem>>, vector<1x256xf32>,
    return
  }
  func.func @transform_0(%arg0: i32) -> (i32, i32) {
    %c0_i32 = arith.constant 0 : i32
    %c0_i32_0 = arith.constant 0 : i32
    return %c0_i32, %arg0 : i32, i32
  }
  func.func @transform_1(%arg0: i32) -> (i32, i32) {
    %c0_i32 = arith.constant 0 : i32
    %c0_i32_0 = arith.constant 0 : i32
    %c0_i32_1 = arith.constant 0 : i32
    return %c0_i32, %c0_i32_0 : i32, i32
  }
  func.func @transform_2(%arg0: i32) -> (i32, i32) {
    %c0_i32 = arith.constant 0 : i32
    %c0_i32_0 = arith.constant 0 : i32
    %c0_i32_1 = arith.constant 0 : i32
    return %c0_i32, %c0_i32_0 : i32, i32
  }
  func.func @transform_3(%arg0: i32) -> (i32, i32) {
    %c0_i32 = arith.constant 0 : i32
    %c0_i32_0 = arith.constant 0 : i32
    %c0_i32_1 = arith.constant 0 : i32
    return %c0_i32, %c0_i32_0 : i32, i32
  }
  func.func @transform_4(%arg0: i32) -> (i32, i32) {
    %c0_i32 = arith.constant 0 : i32
    %c0_i32_0 = arith.constant 0 : i32
    %c0_i32_1 = arith.constant 0 : i32
    return %c0_i32, %c0_i32_0 : i32, i32
  }
  func.func @transform_5(%arg0: i32) -> (i32, i32) {
    %c0_i32 = arith.constant 0 : i32
    %c0_i32_0 = arith.constant 0 : i32
    return %c0_i32, %arg0 : i32, i32
  }
}

</mosaic_0001>

<bundles_post_ra>
// kernel: binary_classifier_forward.1
= control target key start
LH: loop header
LB: loop body
LE: loop exit
PB: predicated region body
PF: predicated region fallthrough
CT: control target
= control target key end

     0   :  { %s1805_s0 = inlined_call_operand.vmem [shape: f32[2,1000], index: 0, kind: input, shape index: {}]   ;;  %s1806_s1 = inlined_call_operand.vmem [shape: f32[50,2], index: 1, kind: input, shape index: {}]   ;;  %s1807_s2 = inlined_call_operand.vmem [shape: f32[50,1], index: 2, kind: input, shape index: {}]   ;;  %s1808_s3 = inlined_call_operand.vmem [shape: f32[50,1], index: 3, kind: input, shape index: {}]   ;;  %s1809_s4 = inlined_call_operand.<no memory space> [shape: f32[1,1], index: 4, kind: input, shape index: {}]   ;;  %s1810_s5 = inlined_call_operand.hbm [shape: f32[1,1000], index: 5, kind: output, shape index: {}]  }
   0x1   :  { %v10_v0 = vstv %s1809_s4 }
   0x2   :  { %11 = vst [vmem:[#allocation2] sm:$0x1] %v10_v0 }
   0x3   :  { %v28_v1 = vld [vmem:[%s1806_s1 + $0x28] sm:$0xff]  ;;  %v23_v2 = vld [vmem:[%s1806_s1] sm:$0xff]  ;;  %v1022_v3 = vmov 1   ;;  %v1023_v5 = vmov 0   ;;  %v25_v6 = vld [vmem:[%s1806_s1 + $0x10] sm:$0xff] }
   0x4   :  { %962 = vset.pattern.permute.xlu0 %v1022_v3  ;;  %958 = vset.pattern.permute.xlu1 %v1022_v3  ;;  %v24_v4 = vld [vmem:[%s1806_s1 + $0x8] sm:$0xff] }
   0x5   :  { %86 = vperm.xlu0 %962, %v28_v1   ;;  %66 = vperm.xlu1 %958, %v23_v2  }
   0x9   :  { %963 = vset.pattern.permute.xlu0 %v1023_v5  ;;  %70 = vperm.xlu1 %958, %v24_v4  }
   0xa   :  { %32 = vperm.xlu0 %963, %v23_v2  }
   0xb   :  { %12 = vsyncpa [#allocation4], 0  ;;  %v26_v7 = vld [vmem:[%s1806_s1 + $0x18] sm:$0xff]  ;;  %v94_v8 = vld [vmem:[%s1807_s2 + $0x8] sm:$0xff]  ;;  %v1811_v25 = vlaneseq  ;;  %vm305_vm0 = vcmask 1041408  }
   0xc   :  { %v93_v9 = vld [vmem:[%s1807_s2] sm:$0xff]  ;;  %v95_v11 = vld [vmem:[%s1807_s2 + $0x10] sm:$0xff]  ;;  %v96_v12 = vld [vmem:[%s1807_s2 + $0x18] sm:$0xff] }
   0xd   :  { %74 = vperm.xlu1 %958, %v25_v6   ;;  %v27_v10 = vld [vmem:[%s1806_s1 + $0x20] sm:$0xff]  ;;  %v136_v13 = vld [vmem:[%s1808_s3 + $0x8] sm:$0xff]  ;;  %v29_v16 = vld [vmem:[%s1806_s1 + $0x30] sm:$0x3]  ;;  %v1123_v26 = vshrl.u32 %v1811_v25, 7 }
   0xe   :  { %37 = vperm.xlu0 %963, %v24_v4   ;;  %v135_v14 = vld [vmem:[%s1808_s3] sm:$0xff]  ;;  %v98_v17 = vld [vmem:[%s1807_s2 + $0x28] sm:$0xff]  ;;  %v99_v18 = vld [vmem:[%s1807_s2 + $0x30] sm:$0x3] }
   0xf   :  { %v97_v15 = vld [vmem:[%s1807_s2 + $0x20] sm:$0xff]  ;;  %v140_v19 = vld [vmem:[%s1808_s3 + $0x28] sm:$0xff]  ;;  %v137_v20 = vld [vmem:[%s1808_s3 + $0x10] sm:$0xff]  ;;  %1834 = vst [vmem:[#allocation6_spill] sm:$0xff] %v1123_v26  ;;  %v1126_v27 = vsub.s32 0, %v1123_v26  ;;  %v214_v28 = vsub.s32 1, %v1123_v26 }
  0x10   :  { %v177_v21 = vld [vmem:[#allocation2] sm:$0x1]  ;;  %v138_v22 = vld [vmem:[%s1808_s3 + $0x18] sm:$0xff]  ;;  %v141_v24 = vld [vmem:[%s1808_s3 + $0x30] sm:$0x3]  ;;  %v218_v29 = vsub.s32 3, %v1123_v26 }
  0x11   :  { %78 = vperm.xlu1 %958, %v26_v7   ;;  %v139_v23 = vld [vmem:[%s1808_s3 + $0x20] sm:$0xff]  ;;  %1835 = vst [vmem:[#allocation7_spill] sm:$0xff] %v1126_v27  ;;  %v186_v31 = vsub.s32 2, %v1123_v26  ;;  %v566_v33 = vld [vmem:[%s1805_s0 + $0x8] sm:$0xf] }
  0x12   :  { %42 = vperm.xlu0 %963, %v25_v6   ;;  %v178_v30 = vld [vmem:[%s1805_s0] sm:$0xf]  ;;  %v379_v32 = vld [vmem:[%s1805_s0 + $0x4] sm:$0xf]  ;;  %v753_v37 = vld [vmem:[%s1805_s0 + $0xc] sm:$0xf]  ;;  %v571_v43 = vrot.slane %v566_v33, %v1126_v27  ;;  %v603_v44 = vrot.slane %v566_v33, %v214_v28  ;;  %v607_v45 = vrot.slane %v566_v33, %v218_v29 }
  0x13   :  { %v183_v34 = vrot.slane %v178_v30, %v1126_v27  ;;  %v215_v35 = vrot.slane %v178_v30, %v214_v28  ;;  %v219_v36 = vrot.slane %v178_v30, %v218_v29  ;;  %v187_v38 = vrot.slane %v178_v30, %v186_v31  ;;  %s1025_s0 = smov [#allocation3]  }
  0x14   :  { %v384_v39 = vrot.slane %v379_v32, %v1126_v27  ;;  %v416_v40 = vrot.slane %v379_v32, %v214_v28  ;;  %v420_v41 = vrot.slane %v379_v32, %v218_v29  ;;  %v388_v42 = vrot.slane %v379_v32, %v186_v31  ;;  %s946_s15 = sshll.u32 %s1025_s0, 4  ;;  %s947_s15 = int_to_ptr.vmem [resolvable:$true] %s946_s15 }
  0x15   :  { %959 = vset.pattern.permute.xlu1 %v1023_v5  ;;  %v575_v46 = vrot.slane %v566_v33, %v186_v31  ;;  %v758_v47 = vrot.slane %v753_v37, %v1126_v27  ;;  %v790_v48 = vrot.slane %v753_v37, %v214_v28  ;;  %v794_v49 = vrot.slane %v753_v37, %v218_v29  ;;  %s998_s16 = scalar_lea.vmem %s947_s15, 128  ;;  %p1003_p1 = scmp.lt.s32.totalorder %s947_s15, %s947_s15 }
  0x16   :  { %47 = vperm.xlu0 %963, %v26_v7   ;;  %107 = vperm.xlu1 %959, %v94_v8   ;;  %v1148_v50 = vrot.slane %v183_v34, %v1126_v27  ;;  %v1150_v51 = vrot.slane %v215_v35, %v214_v28  ;;  %v1152_v52 = vrot.slane %v219_v36, %v214_v28  ;;  %p999_p0 = scmp.ne.s32.totalorder %s947_s15, %s998_s16  ;;  %p1004_p2 = scmp.lt.s32.totalorder %s998_s16, %s998_s16 }
  0x17   :  { %v762_v53 = vrot.slane %v753_v37, %v186_v31  ;;  %v1155_v54 = vrot.slane %v187_v38, %v1126_v27  ;;  %v1158_v55 = vrot.slane %v384_v39, %v1126_v27  ;;  %v1160_v56 = vrot.slane %v416_v40, %v214_v28 }
  0x18   :  { %v1162_v57 = vrot.slane %v420_v41, %v214_v28  ;;  %v1165_v58 = vrot.slane %v388_v42, %v1126_v27  ;;  %v1168_v59 = vrot.slane %v571_v43, %v1126_v27  ;;  %v1170_v60 = vrot.slane %v603_v44, %v214_v28  ;;  %p1005_p3 = por %p1004_p2, %p1003_p1 }
  0x19   :  { %v1172_v61 = vrot.slane %v607_v45, %v214_v28  ;;  %v1175_v0 = vrot.slane %v575_v46, %v1126_v27  ;;  %v1180_v2 = vrot.slane %v790_v48, %v214_v28  ;;  %v1185_v4 = vrot.slane %v762_v53, %v1126_v27 }
  0x1a   :  { %102 = vperm.xlu0 %963, %v93_v9   ;;  %960 = vset.pattern.permute.xlu1 %v1022_v3  ;;  %1836 = vst [vmem:[#allocation8_spill] sm:$0xff] %v1168_v59  ;;  %1837 = vst [vmem:[#allocation9_spill] sm:$0xff] %v1170_v60  ;;  %p1006_p4 = pnand %p1005_p3, %p999_p0 }
  0x1b   :  { %82 = vperm.xlu1 %960, %v27_v10   ;;  %1838 = vst [vmem:[#allocation10_spill] sm:$0xff] %v1172_v61  ;;  %1840 = vst [vmem:[#allocation12_spill] sm:$0xff] %v1180_v2 }
  0x1e   :  { %52 = vperm.xlu0 %963, %v27_v10  }
  0x1f   :  { %961 = vset.pattern.permute.xlu1 %v1023_v5 }
  0x20   :  { %57 = vperm.xlu1 %961, %v28_v1   ;;  %v1178_v1 = vrot.slane %v758_v47, %v1126_v27 }
  0x22   :  { %112 = vperm.xlu0 %963, %v95_v11   ;;  %1839 = vst [vmem:[#allocation11_spill] sm:$0xff] %v1178_v1 }
  0x24   :  { %117 = vperm.xlu1 %961, %v96_v12  }
  0x26   :  { %149 = vperm.xlu0 %963, %v136_v13  }
  0x28   :  { %144 = vperm.xlu1 %961, %v135_v14  }
  0x2a   :  { %122 = vperm.xlu0 %963, %v97_v15  }
  0x2c   :  { %62 = vperm.xlu1 %961, %v29_v16  }
  0x2e   :  { %127 = vperm.xlu0 %963, %v98_v17  }
  0x30   :  { %964 = vset.pattern.permute.xlu1 %v1022_v3  ;;  %v1182_v3 = vrot.slane %v794_v49, %v214_v28 }
  0x31   :  { %90 = vperm.xlu1 %964, %v29_v16  }
  0x32   :  { %132 = vperm.xlu0 %963, %v99_v18   ;;  %1841 = vst [vmem:[#allocation13_spill] sm:$0xff] %v1182_v3 }
  0x35   :  { %965 = vset.pattern.permute.xlu1 %v1023_v5 }
  0x36   :  { %169 = vperm.xlu0 %963, %v140_v19   ;;  %154 = vperm.xlu1 %965, %v137_v20  }
  0x3a   :  { %329 = vperm.xlu0 %963, %v177_v21   ;;  %159 = vperm.xlu1 %965, %v138_v22  }
  0x3e   :  { %164 = vperm.xlu1 %965, %v139_v23  }
  0x42   :  { %174 = vperm.xlu1 %965, %v141_v24  }
  0x84   :  { %v67_v62 = vpop.permute.xlu1 %66  ;;  %v87_v63 = vpop.permute.xlu0 %86 }
  0x85   :  { %v230_v5 = vmul.f32 %v1150_v51, %v67_v62  ;;  %v231_v6 = vmul.f32 %v1152_v52, %v67_v62  ;;  %v1190_v7 = vmul.f32 %v1150_v51, %v87_v63  ;;  %v1193_v8 = vmul.f32 %v1152_v52, %v87_v63 }
  0x86   :  { %v431_v9 = vmul.f32 %v1160_v56, %v67_v62  ;;  %v432_v10 = vmul.f32 %v1162_v57, %v67_v62  ;;  %v1198_v11 = vmul.f32 %v1160_v56, %v87_v63  ;;  %v1201_v12 = vmul.f32 %v1162_v57, %v87_v63 }
  0x87   :  { %v618_v13 = vmul.f32 %v1170_v60, %v67_v62  ;;  %v1205_v14 = vmul.f32 %v1172_v61, %v67_v62  ;;  %v1208_v15 = vmul.f32 %v1170_v60, %v87_v63  ;;  %v1213_v17 = vmul.f32 %v1172_v61, %v87_v63 }
  0x88   :  { %v1210_v16 = vpop.permute.xlu1 %70  ;;  %v1216_v18 = vmul.f32 %v1180_v2, %v67_v62  ;;  %v1219_v19 = vmul.f32 %v1182_v3, %v67_v62  ;;  %v1222_v20 = vmul.f32 %v1180_v2, %v87_v63  ;;  %v1233_v28 = vmul.f32 %v1182_v3, %v87_v63 }
  0x89   :  { %1842 = vst [vmem:[#allocation14_spill] sm:$0xff] %v1208_v15  ;;  %1843 = vst [vmem:[#allocation15_spill] sm:$0xff] %v1210_v16  ;;  %v1224_v21 = vpop.permute.xlu0 %32  ;;  %v232_v22 = vmul.f32 %v1150_v51, %v1210_v16  ;;  %v233_v23 = vmul.f32 %v1152_v52, %v1210_v16  ;;  %v433_v24 = vmul.f32 %v1160_v56, %v1210_v16 }
  0x8a   :  { %1844 = vst [vmem:[#allocation16_spill] sm:$0xff] %v1213_v17  ;;  %1845 = vst [vmem:[#allocation17_spill] sm:$0xff] %v1216_v18  ;;  %v198_v29 = vmul.f32 %v1148_v50, %v1224_v21  ;;  %v199_v30 = vmul.f32 %v1155_v54, %v1224_v21  ;;  %v399_v31 = vmul.f32 %v1158_v55, %v1224_v21 }
  0x8b   :  { %1846 = vst [vmem:[#allocation18_spill] sm:$0xff] %v1219_v19  ;;  %1847 = vst [vmem:[#allocation19_spill] sm:$0xff] %v1222_v20  ;;  %v400_v32 = vmul.f32 %v1165_v58, %v1224_v21  ;;  %v434_v33 = vmul.f32 %v1162_v57, %v1210_v16  ;;  %v586_v34 = vmul.f32 %v1168_v59, %v1224_v21 }
  0x8c   :  { %1848 = vst [vmem:[#allocation20_spill] sm:$0xff] %v1224_v21  ;;  %1849 = vst [vmem:[#allocation21_spill] sm:$0xff] %v1233_v28  ;;  %v587_v35 = vmul.f32 %v1175_v0, %v1224_v21  ;;  %v1251_v36 = vmul.f32 %v1170_v60, %v1210_v16  ;;  %v1253_v37 = vpop.permute.xlu1 %74  ;;  %v1255_v38 = vadd.f32 %v230_v5, %v198_v29 }
  0x8d   :  { %1851 = vst [vmem:[#allocation23_spill] sm:$0xff] %v1253_v37  ;;  %v1257_v39 = vadd.f32 %v231_v6, %v199_v30  ;;  %v1259_v40 = vadd.f32 %v431_v9, %v399_v31  ;;  %v1263_v41 = vmul.f32 %v1172_v61, %v1210_v16  ;;  %v1265_v42 = vpop.permute.xlu0 %37  ;;  %v234_v43 = vmul.f32 %v1150_v51, %v1253_v37 }
  0x8e   :  { %1850 = vst [vmem:[#allocation22_spill] sm:$0xff] %v1251_v36  ;;  %1853 = vst [vmem:[#allocation25_spill] sm:$0xff] %v1265_v42  ;;  %v235_v44 = vmul.f32 %v1152_v52, %v1253_v37  ;;  %v435_v45 = vmul.f32 %v1160_v56, %v1253_v37  ;;  %v1273_v46 = vadd.f32 %v432_v10, %v400_v32 }
  0x8f   :  { %1852 = vst [vmem:[#allocation24_spill] sm:$0xff] %v1263_v41  ;;  %v200_v47 = vmul.f32 %v1148_v50, %v1265_v42  ;;  %v201_v48 = vmul.f32 %v1155_v54, %v1265_v42  ;;  %v401_v49 = vmul.f32 %v1158_v55, %v1265_v42  ;;  %v402_v53 = vmul.f32 %v1165_v58, %v1265_v42 }
  0x90   :  { %v436_v62 = vmul.f32 %v1162_v57, %v1253_v37  ;;  %v1287_v63 = vmul.f32 %v1168_v59, %v1265_v42  ;;  %v1291_v5 = vmul.f32 %v1175_v0, %v1265_v42  ;;  %v1295_v6 = vmul.f32 %v1170_v60, %v1253_v37  ;;  %v79_v9 = vpop.permute.xlu1 %78 }
  0x91   :  { %v246_v10 = vadd.f32 %v232_v22, %v200_v47  ;;  %v247_v29 = vadd.f32 %v233_v23, %v201_v48  ;;  %v1297_v30 = vadd.f32 %v433_v24, %v401_v49  ;;  %v1301_v31 = vmul.f32 %v1172_v61, %v1253_v37  ;;  %v1303_v32 = vpop.permute.xlu0 %42 }
  0x92   :  { %1854 = vst [vmem:[#allocation26_spill] sm:$0xff] %v1287_v63  ;;  %1855 = vst [vmem:[#allocation27_spill] sm:$0xff] %v1291_v5  ;;  %v236_v25 = vmul.f32 %v1150_v51, %v79_v9  ;;  %v237_v26 = vmul.f32 %v1152_v52, %v79_v9  ;;  %v437_v27 = vmul.f32 %v1160_v56, %v79_v9 }
  0x93   :  { %1856 = vst [vmem:[#allocation28_spill] sm:$0xff] %v1295_v6  ;;  %1857 = vst [vmem:[#allocation29_spill] sm:$0xff] %v1301_v31  ;;  %v1308_v28 = vadd.f32 %v434_v33, %v402_v53  ;;  %v438_v20 = vmul.f32 %v1162_v57, %v79_v9  ;;  %v624_v22 = vmul.f32 %v1170_v60, %v79_v9 }
  0x94   :  { %1858 = vst [vmem:[#allocation30_spill] sm:$0xff] %v1303_v32  ;;  %v625_v23 = vmul.f32 %v1172_v61, %v79_v9  ;;  %v811_v24 = vmul.f32 %v1180_v2, %v79_v9  ;;  %v812_v47 = vmul.f32 %v1182_v3, %v79_v9  ;;  %v202_v48 = vmul.f32 %v1148_v50, %v1303_v32 }
  0x95   :  { %v203_v49 = vmul.f32 %v1155_v54, %v1303_v32  ;;  %v403_v33 = vmul.f32 %v1158_v55, %v1303_v32  ;;  %v404_v53 = vmul.f32 %v1165_v58, %v1303_v32  ;;  %v1325_v19 = vmul.f32 %v1168_v59, %v1303_v32  ;;  %v48_v37 = vpop.permute.xlu0 %47  ;;  %v1333_v16 = vpop.permute.xlu1 %107 }
  0x96   :  { %v1329_v18 = vmul.f32 %v1175_v0, %v1303_v32  ;;  %v1331_v9 = vadd.f32 %v618_v13, %v586_v34  ;;  %v248_v42 = vadd.f32 %v234_v43, %v202_v48  ;;  %v1338_v15 = vadd.f32 %v1205_v14, %v587_v35 }
  0x97   :  { %1859 = vst [vmem:[#allocation31_spill] sm:$0xff] %v1325_v19  ;;  %v249_v21 = vadd.f32 %v235_v44, %v203_v49  ;;  %v1335_v17 = vadd.f32 %v435_v45, %v403_v33  ;;  %v204_v31 = vmul.f32 %v1148_v50, %v48_v37  ;;  %v205_v6 = vmul.f32 %v1155_v54, %v48_v37 }
  0x98   :  { %1860 = vst [vmem:[#allocation32_spill] sm:$0xff] %v1329_v18  ;;  %1861 = vst [vmem:[#allocation33_spill] sm:$0xff] %v1331_v9  ;;  %v405_v19 = vmul.f32 %v1158_v55, %v48_v37  ;;  %v406_v32 = vmul.f32 %v1165_v58, %v48_v37  ;;  %v592_v13 = vmul.f32 %v1168_v59, %v48_v37 }
  0x99   :  { %1862 = vst [vmem:[#allocation34_spill] sm:$0xff] %v1335_v17  ;;  %1863 = vst [vmem:[#allocation35_spill] sm:$0xff] %v1338_v15  ;;  %v593_v34 = vmul.f32 %v1175_v0, %v48_v37  ;;  %v779_v43 = vmul.f32 %v1178_v1, %v48_v37  ;;  %v780_v44 = vmul.f32 %v1185_v4, %v48_v37  ;;  %v1350_v49 = vpop.permute.xlu0 %102 }
  0x9a   :  { %v250_v45 = vadd.f32 %v236_v25, %v204_v31  ;;  %v251_v48 = vadd.f32 %v237_v26, %v205_v6  ;;  %v451_v14 = vadd.f32 %v437_v27, %v405_v19  ;;  %v1348_v35 = vadd.f32 %v436_v62, %v404_v53  ;;  %v83_v41 = vpop.permute.xlu1 %82 }
  0x9b   :  { %v452_v33 = vadd.f32 %v438_v20, %v406_v32  ;;  %v638_v15 = vadd.f32 %v624_v22, %v592_v13  ;;  %v639_v9 = vadd.f32 %v625_v23, %v593_v34  ;;  %v825_v18 = vadd.f32 %v811_v24, %v779_v43 }
  0x9c   :  { %1864 = vst [vmem:[#allocation36_spill] sm:$0xff] %v1348_v35  ;;  %v826_v5 = vadd.f32 %v812_v47, %v780_v44  ;;  %v1354_v36 = vadd.f32 %v1255_v38, %v1350_v49  ;;  %v1358_v37 = vadd.f32 %v1257_v39, %v1350_v49  ;;  %v1361_v25 = vadd.f32 %v246_v10, %v1333_v16 }
  0x9d   :  { %v238_v26 = vmul.f32 %v1150_v51, %v83_v41  ;;  %v239_v27 = vmul.f32 %v1152_v52, %v83_v41  ;;  %v439_v19 = vmul.f32 %v1160_v56, %v83_v41  ;;  %v1367_v20 = vadd.f32 %v247_v29, %v1333_v16  ;;  %v53_v31 = vpop.permute.xlu0 %52 }
  0x9e   :  { %v440_v62 = vmul.f32 %v1162_v57, %v83_v41  ;;  %v626_v38 = vmul.f32 %v1170_v60, %v83_v41  ;;  %v627_v6 = vmul.f32 %v1172_v61, %v83_v41  ;;  %v813_v39 = vmul.f32 %v1180_v2, %v83_v41 }
  0x9f   :  { %v814_v10 = vmul.f32 %v1182_v3, %v83_v41  ;;  %v272_v32 = vmax.f32 %v1354_v36, 0.0  ;;  %v273_v22 = vmax.f32 %v1358_v37, 0.0  ;;  %v274_v23 = vmax.f32 %v1361_v25, 0.0  ;;  %v1381_v13 = vpop.permute.xlu1 %57 }
  0xa0   :  { %v206_v29 = vmul.f32 %v1148_v50, %v53_v31  ;;  %v207_v24 = vmul.f32 %v1155_v54, %v53_v31  ;;  %v407_v47 = vmul.f32 %v1158_v55, %v53_v31  ;;  %v408_v53 = vmul.f32 %v1165_v58, %v53_v31 }
  0xa1   :  { %v594_v34 = vmul.f32 %v1168_v59, %v53_v31  ;;  %v595_v41 = vmul.f32 %v1175_v0, %v53_v31  ;;  %v781_v36 = vmul.f32 %v1178_v1, %v53_v31  ;;  %v782_v43 = vmul.f32 %v1185_v4, %v53_v31  ;;  %v1388_v2 = vpop.permute.xlu0 %112 }
  0xa2   :  { %v252_v44 = vadd.f32 %v238_v26, %v206_v29  ;;  %v253_v37 = vadd.f32 %v239_v27, %v207_v24  ;;  %v453_v25 = vadd.f32 %v439_v19, %v407_v47  ;;  %v275_v3 = vmax.f32 %v1367_v20, 0.0 }
  0xa3   :  { %v454_v63 = vadd.f32 %v440_v62, %v408_v53  ;;  %v640_v61 = vadd.f32 %v626_v38, %v594_v34  ;;  %v641_v60 = vadd.f32 %v627_v6, %v595_v41  ;;  %v827_v35 = vadd.f32 %v813_v39, %v781_v36  ;;  %v118_v26 = vpop.permute.xlu1 %117 }
  0xa4   :  { %v828_v17 = vadd.f32 %v814_v10, %v782_v43  ;;  %v208_v59 = vmul.f32 %v1148_v50, %v1381_v13  ;;  %v209_v1 = vmul.f32 %v1155_v54, %v1381_v13  ;;  %v1395_v31 = vadd.f32 %v248_v42, %v1388_v2 }
  0xa5   :  { %v1398_v27 = vadd.f32 %v249_v21, %v1388_v2  ;;  %v409_v19 = vmul.f32 %v1158_v55, %v1381_v13  ;;  %v1404_v20 = vmul.f32 %v1165_v58, %v1381_v13  ;;  %v1408_v62 = vadd.f32 %v1259_v40, %v1350_v49  ;;  %v1418_v21 = vpop.permute.xlu0 %149 }
  0xa6   :  { %v1410_v38 = vadd.f32 %v250_v45, %v118_v26  ;;  %v1412_v6 = vadd.f32 %v251_v48, %v118_v26  ;;  %v1414_v42 = vadd.f32 %v451_v14, %v118_v26  ;;  %v1416_v39 = vadd.f32 %v452_v33, %v118_v26 }
  0xa7   :  { %v1420_v10 = vadd.f32 %v638_v15, %v118_v26  ;;  %v1422_v29 = vadd.f32 %v639_v9, %v118_v26  ;;  %v1424_v24 = vadd.f32 %v825_v18, %v118_v26  ;;  %v1426_v47 = vadd.f32 %v826_v5, %v118_v26  ;;  %v1435_v33 = vpop.permute.xlu1 %144 }
  0xa8   :  { %v278_v40 = vmax.f32 %v1410_v38, 0.0  ;;  %v279_v45 = vmax.f32 %v1412_v6, 0.0  ;;  %v1433_v14 = vadd.f32 %v1273_v46, %v1350_v49  ;;  %v254_v34 = vadd.f32 %v1190_v7, %v208_v59 }
  0xa9   :  { %v255_v41 = vadd.f32 %v1193_v8, %v209_v1  ;;  %v276_v36 = vmax.f32 %v1395_v31, 0.0  ;;  %v123_v46 = vpop.permute.xlu0 %122  ;;  %v277_v43 = vmax.f32 %v1398_v27, 0.0  ;;  %v286_v26 = vmul.f32 %v272_v32, %v1435_v33 }
  0xaa   :  { %v287_v15 = vmul.f32 %v273_v22, %v1435_v33  ;;  %v288_v9 = vmul.f32 %v274_v23, %v1418_v21  ;;  %v1449_v18 = vadd.f32 %v252_v44, %v123_v46  ;;  %v1451_v5 = vadd.f32 %v253_v37, %v123_v46 }
  0xab   :  { %v1453_v53 = vadd.f32 %v453_v25, %v123_v46  ;;  %v1455_v59 = vadd.f32 %v454_v63, %v123_v46  ;;  %v1457_v1 = vpop.permute.xlu1 %62  ;;  %v1459_v7 = vadd.f32 %v640_v61, %v123_v46  ;;  %v1461_v8 = vadd.f32 %v641_v60, %v123_v46 }
  0xac   :  { %v1463_v31 = vadd.f32 %v827_v35, %v123_v46  ;;  %v1465_v32 = vadd.f32 %v828_v17, %v123_v46  ;;  %v289_v37 = vmul.f32 %v275_v3, %v1418_v21  ;;  %v210_v27 = vmul.f32 %v1148_v50, %v1457_v1 }
  0xad   :  { %v1471_v63 = vpop.permute.xlu0 %127  ;;  %v211_v3 = vmul.f32 %v1155_v54, %v1457_v1  ;;  %v300_v23 = vadd.f32 %v288_v9, %v286_v26  ;;  %v411_v61 = vmul.f32 %v1158_v55, %v1457_v1  ;;  %v412_v17 = vmul.f32 %v1165_v58, %v1457_v1 }
  0xae   :  { %v268_v46 = vadd.f32 %v254_v34, %v1471_v63  ;;  %v269_v44 = vadd.f32 %v255_v41, %v1471_v63  ;;  %v314_v25 = vadd.f32 %v289_v37, %v287_v15  ;;  %v455_v50 = vadd.f32 %v1198_v11, %v409_v19 }
  0xaf   :  { %v456_v9 = vadd.f32 %v1201_v12, %v1404_v20  ;;  %v461_v58 = vadd.f32 %v1297_v30, %v1333_v16  ;;  %v462_v11 = vadd.f32 %v1308_v28, %v1333_v16  ;;  %v473_v20 = vmax.f32 %v1408_v62, 0.0 }
  0xb0   :  { %v1486_v60 = vpop.permute.xlu1 %90  ;;  %v282_v35 = vmax.f32 %v268_v46, 0.0  ;;  %v283_v22 = vmax.f32 %v269_v44, 0.0  ;;  %v1871_v38 = vmax.f32 %v1424_v24, 0.0  ;;  %v1873_v24 = vmax.f32 %v1449_v18, 0.0 }
  0xb1   :  { %v1491_v34 = vpop.permute.xlu0 %132  ;;  %v242_v41 = vmul.f32 %v1150_v51, %v1486_v60  ;;  %v243_v54 = vmul.f32 %v1152_v52, %v1486_v60  ;;  %v443_v55 = vmul.f32 %v1160_v56, %v1486_v60  ;;  %v444_v15 = vmul.f32 %v1162_v57, %v1486_v60  ;;  %v1865_v51 = vld [vmem:[#allocation34_spill] sm:$0xff]  ;;  %v1866_v56 = vld [vmem:[#allocation36_spill] sm:$0xff] }
  0xb2   :  { %v463_v19 = vadd.f32 %v1865_v51, %v1388_v2  ;;  %v464_v46 = vadd.f32 %v1866_v56, %v1388_v2  ;;  %v469_v57 = vadd.f32 %v455_v50, %v1471_v63  ;;  %v470_v12 = vadd.f32 %v456_v9, %v1471_v63 }
  0xb3   :  { %v256_v26 = vadd.f32 %v242_v41, %v210_v27  ;;  %v257_v52 = vadd.f32 %v243_v54, %v211_v3  ;;  %v457_v44 = vadd.f32 %v443_v55, %v411_v61  ;;  %v458_v37 = vadd.f32 %v444_v15, %v412_v17 }
  0xb4   :  { %v474_v17 = vmax.f32 %v1433_v14, 0.0  ;;  %v475_v9 = vmax.f32 %v461_v58, 0.0  ;;  %v477_v14 = vmax.f32 %v463_v19, 0.0  ;;  %v483_v56 = vmax.f32 %v469_v57, 0.0 }
  0xb5   :  { %v1514_v30 = vpop.permute.xlu0 %169  ;;  %v1516_v48 = vpop.permute.xlu1 %154  ;;  %v1519_v28 = vadd.f32 %v256_v26, %v1491_v34  ;;  %v1522_v27 = vadd.f32 %v257_v52, %v1491_v34  ;;  %v1525_v61 = vadd.f32 %v457_v44, %v1491_v34  ;;  %v1532_v41 = vadd.f32 %v458_v37, %v1491_v34 }
  0xb6   :  { %v290_v3 = vmul.f32 %v276_v36, %v1516_v48  ;;  %v291_v50 = vmul.f32 %v277_v43, %v1516_v48  ;;  %v296_v62 = vmul.f32 %v282_v35, %v1514_v30  ;;  %v297_v15 = vmul.f32 %v283_v22, %v1514_v30 }
  0xb7   :  { %v476_v52 = vmax.f32 %v462_v11, 0.0  ;;  %v478_v36 = vmax.f32 %v464_v46, 0.0  ;;  %v484_v43 = vmax.f32 %v470_v12, 0.0  ;;  %v485_v35 = vmax.f32 %v1525_v61, 0.0 }
  0xb8   :  { %v301_v51 = vadd.f32 %v300_v23, %v290_v3  ;;  %v315_v26 = vadd.f32 %v314_v25, %v291_v50  ;;  %v1867_v55 = vmax.f32 %v1414_v42, 0.0  ;;  %v1868_v25 = vmax.f32 %v1416_v39, 0.0 }
  0xb9   :  { %v160_v44 = vpop.permute.xlu1 %159  ;;  %v1869_v11 = vmax.f32 %v1420_v10, 0.0  ;;  %v1870_v46 = vmax.f32 %v1422_v29, 0.0  ;;  %v1872_v42 = vmax.f32 %v1426_v47, 0.0  ;;  %v487_v39 = vmul.f32 %v473_v20, %v1435_v33 }
  0xba   :  { %v292_v37 = vmul.f32 %v278_v40, %v160_v44  ;;  %v293_v54 = vmul.f32 %v279_v45, %v160_v44  ;;  %v493_v22 = vmul.f32 %v1867_v55, %v160_v44  ;;  %v494_v58 = vmul.f32 %v1868_v25, %v160_v44 }
  0xbb   :  { %v1549_v19 = vmul.f32 %v1869_v11, %v160_v44  ;;  %v1553_v57 = vmul.f32 %v1870_v46, %v160_v44  ;;  %v1557_v6 = vmul.f32 %v1871_v38, %v160_v44  ;;  %v1561_v40 = vmul.f32 %v1872_v42, %v160_v44 }
  0xbc   :  { %v302_v45 = vadd.f32 %v301_v51, %v292_v37  ;;  %v316_v12 = vadd.f32 %v315_v26, %v293_v54  ;;  %v488_v10 = vmul.f32 %v474_v17, %v1435_v33  ;;  %v489_v50 = vmul.f32 %v475_v9, %v1418_v21 }
  0xbd   :  { %v165_v3 = vpop.permute.xlu1 %164  ;;  %v490_v29 = vmul.f32 %v476_v52, %v1418_v21  ;;  %v491_v55 = vmul.f32 %v477_v14, %v1516_v48  ;;  %v1874_v47 = vmax.f32 %v1451_v5, 0.0  ;;  %v1875_v51 = vmax.f32 %v1453_v53, 0.0 }
  0xbe   :  { %v294_v25 = vmul.f32 %v1873_v24, %v165_v3  ;;  %v1876_v20 = vmax.f32 %v1455_v59, 0.0  ;;  %v1877_v17 = vmax.f32 %v1459_v7, 0.0  ;;  %v1878_v9 = vmax.f32 %v1461_v8, 0.0  ;;  %v1881_v24 = vld [vmem:[#allocation8_spill] sm:$0xff] }
  0xbf   :  { %v295_v44 = vmul.f32 %v1874_v47, %v165_v3  ;;  %v495_v54 = vmul.f32 %v1875_v51, %v165_v3  ;;  %v1879_v18 = vmax.f32 %v1463_v31, 0.0  ;;  %v1880_v5 = vmax.f32 %v1465_v32, 0.0 }
  0xc0   :  { %v496_v26 = vmul.f32 %v1876_v20, %v165_v3  ;;  %v1578_v37 = vmul.f32 %v1877_v17, %v165_v3  ;;  %v1582_v52 = vmul.f32 %v1878_v9, %v165_v3  ;;  %v303_v53 = vadd.f32 %v302_v45, %v294_v25  ;;  %v1887_v25 = vld [vmem:[#allocation24_spill] sm:$0xff]  ;;  %v1888_v20 = vld [vmem:[#allocation31_spill] sm:$0xff] }
  0xc1   :  { %v1586_v14 = vmul.f32 %v1879_v18, %v165_v3  ;;  %v1590_v11 = vmul.f32 %v1880_v5, %v165_v3  ;;  %v317_v46 = vadd.f32 %v316_v12, %v295_v44  ;;  %v492_v59 = vmul.f32 %v478_v36, %v1516_v48  ;;  %v1883_v3 = vld [vmem:[#allocation10_spill] sm:$0xff]  ;;  %v1889_v17 = vld [vmem:[#allocation28_spill] sm:$0xff] }
  0xc2   :  { %v497_v7 = vmul.f32 %v483_v56, %v1514_v30  ;;  %v498_v38 = vmul.f32 %v484_v43, %v1514_v30  ;;  %v501_v42 = vadd.f32 %v489_v50, %v487_v39  ;;  %v514_v8 = vadd.f32 %v490_v29, %v488_v10  ;;  %v1882_v43 = vld [vmem:[#allocation9_spill] sm:$0xff]  ;;  %v1884_v10 = vld [vmem:[#allocation26_spill] sm:$0xff]  ;;  %v1886_v29 = vld [vmem:[#allocation27_spill] sm:$0xff] }
  0xc3   :  { %v596_v47 = vmul.f32 %v1881_v24, %v1381_v13  ;;  %v1597_v31 = vadd.f32 %v303_v53, %v296_v62  ;;  %v1599_v51 = vadd.f32 %v317_v46, %v297_v15  ;;  %v597_v32 = vmul.f32 %v1175_v0, %v1381_v13  ;;  %v1885_v15 = vld [vmem:[#allocation22_spill] sm:$0xff]  ;;  %v1890_v5 = vld [vmem:[#allocation32_spill] sm:$0xff]  ;;  %v1891_v53 = vld [vmem:[#allocation29_spill] sm:$0xff] }
  0xc4   :  { %v598_v45 = vmul.f32 %v1881_v24, %v1457_v1  ;;  %v502_v36 = vadd.f32 %v501_v42, %v491_v55  ;;  %v515_v12 = vadd.f32 %v514_v8, %v492_v59  ;;  %v599_v56 = vmul.f32 %v1175_v0, %v1457_v1  ;;  %v1892_v46 = vld [vmem:[#allocation14_spill] sm:$0xff]  ;;  %v1893_v42 = vld [vmem:[#allocation16_spill] sm:$0xff] }
  0xc5   :  { %v630_v39 = vmul.f32 %v1882_v43, %v1486_v60  ;;  %v631_v62 = vmul.f32 %v1883_v3, %v1486_v60  ;;  %v634_v50 = vadd.f32 %v1885_v15, %v1884_v10  ;;  %v635_v44 = vadd.f32 %v1887_v25, %v1886_v29  ;;  %v1894_v3 = vld [vmem:[#allocation33_spill] sm:$0xff]  ;;  %v1895_v29 = vld [vmem:[#allocation35_spill] sm:$0xff] }
  0xc6   :  { %v636_v9 = vadd.f32 %v1889_v17, %v1888_v20  ;;  %v503_v55 = vadd.f32 %v502_v36, %v493_v22  ;;  %v516_v18 = vadd.f32 %v515_v12, %v494_v58  ;;  %v637_v0 = vadd.f32 %v1891_v53, %v1890_v5 }
  0xc7   :  { %v642_v59 = vadd.f32 %v1892_v46, %v596_v47  ;;  %v643_v8 = vadd.f32 %v1893_v42, %v597_v32  ;;  %v644_v24 = vadd.f32 %v630_v39, %v598_v45  ;;  %v645_v43 = vadd.f32 %v631_v62, %v599_v56 }
  0xc8   :  { %v646_v10 = vadd.f32 %v1894_v3, %v1350_v49  ;;  %v504_v15 = vadd.f32 %v503_v55, %v495_v54  ;;  %v517_v23 = vadd.f32 %v516_v18, %v496_v26  ;;  %v647_v25 = vadd.f32 %v1895_v29, %v1350_v49  ;;  %v1898_v29 = vld [vmem:[#allocation25_spill] sm:$0xff] }
  0xc9   :  { %v648_v22 = vadd.f32 %v634_v50, %v1333_v16  ;;  %v649_v58 = vadd.f32 %v635_v44, %v1333_v16  ;;  %v650_v36 = vadd.f32 %v636_v9, %v1388_v2  ;;  %v651_v47 = vadd.f32 %v637_v0, %v1388_v2 }
  0xca   :  { %v656_v32 = vadd.f32 %v642_v59, %v1471_v63  ;;  %v1630_v45 = vadd.f32 %v504_v15, %v497_v7  ;;  %v1632_v12 = vadd.f32 %v517_v23, %v498_v38  ;;  %v657_v54 = vadd.f32 %v643_v8, %v1471_v63  ;;  %v1896_v8 = vld [vmem:[#allocation20_spill] sm:$0xff] }
  0xcb   :  { %v1636_v26 = vadd.f32 %v644_v24, %v1491_v34  ;;  %v1639_v56 = vadd.f32 %v645_v43, %v1491_v34  ;;  %v660_v39 = vmax.f32 %v646_v10, 0.0  ;;  %v661_v62 = vmax.f32 %v647_v25, 0.0  ;;  %v1897_v24 = vld [vmem:[#allocation11_spill] sm:$0xff] }
  0xcc   :  { %v662_v50 = vmax.f32 %v648_v22, 0.0  ;;  %v663_v44 = vmax.f32 %v649_v58, 0.0  ;;  %v664_v20 = vmax.f32 %v650_v36, 0.0  ;;  %v665_v17 = vmax.f32 %v651_v47, 0.0  ;;  %v1899_v58 = vld [vmem:[#allocation30_spill] sm:$0xff] }
  0xcd   :  { %v670_v9 = vmax.f32 %v656_v32, 0.0  ;;  %v671_v55 = vmax.f32 %v657_v54, 0.0  ;;  %v674_v38 = vmul.f32 %v660_v39, %v1435_v33  ;;  %v675_v18 = vmul.f32 %v661_v62, %v1435_v33 }
  0xce   :  { %v676_v5 = vmul.f32 %v662_v50, %v1418_v21  ;;  %v677_v53 = vmul.f32 %v663_v44, %v1418_v21  ;;  %v678_v0 = vmul.f32 %v664_v20, %v1516_v48  ;;  %v679_v46 = vmul.f32 %v665_v17, %v1516_v48  ;;  %v1900_v20 = vld [vmem:[#allocation15_spill] sm:$0xff]  ;;  %v1901_v17 = vld [vmem:[#allocation12_spill] sm:$0xff] }
  0xcf   :  { %v684_v59 = vmul.f32 %v670_v9, %v1514_v30  ;;  %v685_v42 = vmul.f32 %v671_v55, %v1514_v30  ;;  %v773_v43 = vmul.f32 %v1897_v24, %v1896_v8  ;;  %v774_v15 = vmul.f32 %v1185_v4, %v1896_v8  ;;  %v1902_v55 = vld [vmem:[#allocation13_spill] sm:$0xff] }
  0xd0   :  { %v688_v3 = vadd.f32 %v676_v5, %v674_v38  ;;  %v701_v10 = vadd.f32 %v677_v53, %v675_v18  ;;  %v775_v25 = vmul.f32 %v1897_v24, %v1898_v29  ;;  %v776_v22 = vmul.f32 %v1185_v4, %v1898_v29  ;;  %v1903_v18 = vld [vmem:[#allocation23_spill] sm:$0xff] }
  0xd1   :  { %v777_v36 = vmul.f32 %v1897_v24, %v1899_v58  ;;  %v778_v47 = vmul.f32 %v1185_v4, %v1899_v58  ;;  %v783_v32 = vmul.f32 %v1897_v24, %v1381_v13  ;;  %v784_v62 = vmul.f32 %v1185_v4, %v1381_v13 }
  0xd2   :  { %v689_v54 = vadd.f32 %v688_v3, %v678_v0  ;;  %v702_v39 = vadd.f32 %v701_v10, %v679_v46  ;;  %v785_v50 = vmul.f32 %v1897_v24, %v1457_v1  ;;  %v786_v44 = vmul.f32 %v1185_v4, %v1457_v1  ;;  %v1904_v1 = vld [vmem:[#allocation17_spill] sm:$0xff]  ;;  %v1905_v24 = vld [vmem:[#allocation18_spill] sm:$0xff] }
  0xd3   :  { %v807_v9 = vmul.f32 %v1901_v17, %v1900_v20  ;;  %v808_v38 = vmul.f32 %v1902_v55, %v1900_v20  ;;  %v809_v5 = vmul.f32 %v1901_v17, %v1903_v18  ;;  %v810_v13 = vmul.f32 %v1902_v55, %v1903_v18  ;;  %v1907_v18 = vld [vmem:[#allocation21_spill] sm:$0xff] }
  0xd4   :  { %v690_v53 = vadd.f32 %v689_v54, %v1549_v19  ;;  %v703_v0 = vadd.f32 %v702_v39, %v1553_v57  ;;  %v817_v46 = vmul.f32 %v1901_v17, %v1486_v60  ;;  %v818_v4 = vmul.f32 %v1902_v55, %v1486_v60  ;;  %v1906_v39 = vld [vmem:[#allocation19_spill] sm:$0xff] }
  0xd5   :  { %v819_v8 = vadd.f32 %v1904_v1, %v773_v43  ;;  %v820_v3 = vadd.f32 %v1905_v24, %v774_v15  ;;  %v821_v10 = vadd.f32 %v807_v9, %v775_v25  ;;  %v822_v57 = vadd.f32 %v808_v38, %v776_v22  ;;  %v175_v38 = vpop.permute.xlu1 %174 }
  0xd6   :  { %v691_v29 = vadd.f32 %v690_v53, %v1578_v37  ;;  %v704_v19 = vadd.f32 %v703_v0, %v1582_v52  ;;  %v823_v58 = vadd.f32 %v809_v5, %v777_v36  ;;  %v824_v54 = vadd.f32 %v810_v13, %v778_v47 }
  0xd7   :  { %v829_v20 = vadd.f32 %v1906_v39, %v783_v32  ;;  %v830_v17 = vadd.f32 %v1907_v18, %v784_v62  ;;  %v831_v23 = vadd.f32 %v817_v46, %v785_v50  ;;  %v832_v43 = vadd.f32 %v818_v4, %v786_v44 }
  0xd8   :  { %v692_v7 = vadd.f32 %v691_v29, %v684_v59  ;;  %v1691_v60 = vadd.f32 %v704_v19, %v685_v42  ;;  %v833_v15 = vadd.f32 %v819_v8, %v1350_v49  ;;  %v834_v25 = vadd.f32 %v820_v3, %v1350_v49 }
  0xd9   :  { %v835_v37 = vadd.f32 %v821_v10, %v1333_v16  ;;  %v836_v52 = vadd.f32 %v822_v57, %v1333_v16  ;;  %v837_v22 = vadd.f32 %v823_v58, %v1388_v2  ;;  %v838_v36 = vadd.f32 %v824_v54, %v1388_v2 }
  0xda   :  { %v843_v47 = vadd.f32 %v829_v20, %v1471_v63  ;;  %v844_v32 = vadd.f32 %v830_v17, %v1471_v63  ;;  %v1702_v59 = vadd.f32 %v831_v23, %v1491_v34  ;;  %v1705_v42 = vadd.f32 %v832_v43, %v1491_v34 }
  0xdb   :  { %v847_v62 = vmax.f32 %v833_v15, 0.0  ;;  %v848_v49 = vmax.f32 %v834_v25, 0.0  ;;  %v849_v50 = vmax.f32 %v835_v37, 0.0  ;;  %v850_v44 = vmax.f32 %v836_v52, 0.0 }
  0xdc   :  { %v851_v9 = vmax.f32 %v837_v22, 0.0  ;;  %v852_v16 = vmax.f32 %v838_v36, 0.0  ;;  %v857_v55 = vmax.f32 %v843_v47, 0.0  ;;  %v858_v5 = vmax.f32 %v844_v32, 0.0 }
  0xdd   :  { %v859_v2 = vmax.f32 %v1702_v59, 0.0  ;;  %v860_v53 = vmax.f32 %v1705_v42, 0.0  ;;  %v861_v63 = vmul.f32 %v847_v62, %v1435_v33  ;;  %v862_v23 = vmul.f32 %v848_v49, %v1435_v33 }
  0xde   :  { %v863_v34 = vmul.f32 %v849_v50, %v1418_v21  ;;  %v864_v0 = vmul.f32 %v850_v44, %v1418_v21  ;;  %v865_v13 = vmul.f32 %v851_v9, %v1516_v48  ;;  %v866_v46 = vmul.f32 %v852_v16, %v1516_v48  ;;  %v330_v9 = vpop.permute.xlu0 %329 }
  0xdf   :  { %v871_v4 = vmul.f32 %v857_v55, %v1514_v30  ;;  %v872_v1 = vmul.f32 %v858_v5, %v1514_v30  ;;  %v1908_v8 = vmax.f32 %v1519_v28, 0.0  ;;  %v1909_v29 = vmax.f32 %v1522_v27, 0.0 }
  0xe0   :  { %v875_v3 = vadd.f32 %v863_v34, %v861_v63  ;;  %v888_v10 = vadd.f32 %v864_v0, %v862_v23  ;;  %v499_v19 = vmul.f32 %v485_v35, %v175_v38  ;;  %v1910_v57 = vmax.f32 %v1532_v41, 0.0 }
  0xe1   :  { %v298_v24 = vmul.f32 %v1908_v8, %v175_v38  ;;  %v299_v33 = vmul.f32 %v1909_v29, %v175_v38  ;;  %v1911_v58 = vmax.f32 %v1636_v26, 0.0  ;;  %v1912_v30 = vmax.f32 %v1639_v56, 0.0 }
  0xe2   :  { %v500_v48 = vmul.f32 %v1910_v57, %v175_v38  ;;  %v876_v39 = vadd.f32 %v875_v3, %v865_v13  ;;  %v889_v20 = vadd.f32 %v888_v10, %v866_v46  ;;  %v506_v35 = vsel %vm305_vm0, %v499_v19, 0.0 }
  0xe3   :  { %v306_v21 = vsel %vm305_vm0, %v298_v24, 0.0  ;;  %v686_v54 = vmul.f32 %v1911_v58, %v175_v38  ;;  %v687_v28 = vmul.f32 %v1912_v30, %v175_v38  ;;  %v319_v27 = vsel %vm305_vm0, %v299_v33, 0.0 }
  0xe4   :  { %v307_v18 = vadd.f32 %v306_v21, %v1597_v31  ;;  %v320_v61 = vadd.f32 %v319_v27, %v1599_v51  ;;  %v519_v17 = vsel %vm305_vm0, %v500_v48, 0.0  ;;  %v877_v26 = vadd.f32 %v876_v39, %v1557_v6 }
  0xe5   :  { %v693_v41 = vsel %vm305_vm0, %v686_v54, 0.0  ;;  %v890_v43 = vadd.f32 %v889_v20, %v1561_v40  ;;  %v507_v15 = vadd.f32 %v506_v35, %v1630_v45  ;;  %v520_v31 = vadd.f32 %v519_v17, %v1632_v12 }
  0xe6   :  { %v308_v56 = vrot.slane %v307_v18, 4  ;;  %v321_v25 = vrot.slane %v320_v61, 4  ;;  %v694_v37 = vadd.f32 %v693_v41, %v692_v7  ;;  %v706_v52 = vsel %vm305_vm0, %v687_v28, 0.0 }
  0xe7   :  { %v878_v51 = vadd.f32 %v877_v26, %v1586_v14  ;;  %v891_v22 = vadd.f32 %v890_v43, %v1590_v11  ;;  %v508_v47 = vrot.slane %v507_v15, 4  ;;  %v521_v59 = vrot.slane %v520_v31, 4 }
  0xe8   :  { %v309_v36 = vadd.f32 %v308_v56, %v307_v18  ;;  %v322_v32 = vadd.f32 %v321_v25, %v320_v61  ;;  %v695_v6 = vrot.slane %v694_v37, 4  ;;  %v707_v40 = vadd.f32 %v706_v52, %v1691_v60 }
  0xe9   :  { %v879_v42 = vadd.f32 %v878_v51, %v871_v4  ;;  %v892_v62 = vadd.f32 %v891_v22, %v872_v1  ;;  %v509_v49 = vadd.f32 %v508_v47, %v507_v15  ;;  %v522_v12 = vadd.f32 %v521_v59, %v520_v31  ;;  %v1913_v4 = vld [vmem:[#allocation7_spill] sm:$0xff] }
  0xea   :  { %v310_v45 = vrot.slane %v309_v36, 2  ;;  %v323_v50 = vrot.slane %v322_v32, 2  ;;  %v696_v7 = vadd.f32 %v695_v6, %v694_v37  ;;  %v708_v44 = vrot.slane %v707_v40, 4 }
  0xeb   :  { %v510_v14 = vrot.slane %v509_v49, 2  ;;  %v873_v55 = vmul.f32 %v859_v2, %v175_v38  ;;  %v874_v11 = vmul.f32 %v860_v53, %v175_v38  ;;  %v523_v63 = vrot.slane %v522_v12, 2 }
  0xec   :  { %v311_v16 = vadd.f32 %v310_v45, %v309_v36  ;;  %v324_v5 = vadd.f32 %v323_v50, %v322_v32  ;;  %v697_v23 = vrot.slane %v696_v7, 2  ;;  %v709_v34 = vadd.f32 %v708_v44, %v707_v40 }
  0xed   :  { %v511_v0 = vadd.f32 %v510_v14, %v509_v49  ;;  %v880_v60 = vsel %vm305_vm0, %v873_v55, 0.0  ;;  %v893_v13 = vsel %vm305_vm0, %v874_v11, 0.0  ;;  %v335_v1 = vrot.slane %v330_v9, %v1913_v4 }
  0xee   :  { %v312_v46 = vrot.slane %v311_v16, 1  ;;  %v524_v8 = vadd.f32 %v523_v63, %v522_v12  ;;  %v698_v24 = vadd.f32 %v697_v23, %v696_v7  ;;  %v881_v3 = vadd.f32 %v880_v60, %v879_v42 }
  0xef   :  { %v710_v10 = vrot.slane %v709_v34, 2  ;;  %v894_v29 = vadd.f32 %v893_v13, %v892_v62  ;;  %v325_v2 = vrot.slane %v324_v5, 1  ;;  %v512_v57 = vrot.slane %v511_v0, 1 }
  0xf0   :  { %v313_v33 = vadd.f32 %v312_v46, %v311_v16  ;;  %v882_v38 = vrot.slane %v881_v3, 4  ;;  %v525_v58 = vrot.slane %v524_v8, 1  ;;  %v699_v54 = vrot.slane %v698_v24, 1 }
  0xf1   :  { %v895_v53 = vrot.slane %v894_v29, 4  ;;  %v326_v19 = vadd.f32 %v325_v2, %v324_v5  ;;  %v711_v30 = vadd.f32 %v710_v10, %v709_v34  ;;  %v513_v27 = vadd.f32 %v512_v57, %v511_v0 }
  0xf2   :  { %v1747_v21 = vadd.f32 %v335_v1, %v313_v33  ;;  %v883_v48 = vadd.f32 %v882_v38, %v881_v3  ;;  %v526_v61 = vadd.f32 %v525_v58, %v524_v8  ;;  %v700_v15 = vadd.f32 %v699_v54, %v698_v24 }
  0xf3   :  { %v896_v28 = vadd.f32 %v895_v53, %v894_v29  ;;  %v1749_v39 = vadd.f32 %v335_v1, %v326_v19  ;;  %v1753_v43 = vadd.f32 %v513_v27, %v335_v1  ;;  %v712_v52 = vrot.slane %v711_v30, 1 }
  0xf4   :  { %v338_v20 = vand.u32 2147483647, %v1747_v21  ;;  %v884_v18 = vrot.slane %v883_v48, 2  ;;  %v1755_v56 = vadd.f32 %v526_v61, %v335_v1  ;;  %v1759_v32 = vadd.f32 %v700_v15, %v335_v1 }
  0xf5   :  { %v897_v35 = vrot.slane %v896_v28, 2  ;;  %v339_v17 = vand.u32 2147483647, %v1749_v39  ;;  %v529_v51 = vand.u32 2147483647, %v1753_v43  ;;  %v713_v47 = vadd.f32 %v712_v52, %v711_v30 }
  0xf6   :  { %v340_v41 = vsub.f32 0.0, %v338_v20  ;;  %v885_v26 = vadd.f32 %v884_v18, %v883_v48  ;;  %v530_v22 = vand.u32 2147483647, %v1755_v56  ;;  %v716_v45 = vand.u32 2147483647, %v1759_v32 }
  0xf7   :  { %v898_v25 = vadd.f32 %v897_v35, %v896_v28  ;;  %v341_v31 = vsub.f32 0.0, %v339_v17  ;;  %v531_v59 = vsub.f32 0.0, %v529_v51  ;;  %v1761_v62 = vadd.f32 %v713_v47, %v335_v1  ;;  %v1914_v35 = vld [vmem:[#allocation6_spill] sm:$0xff] }
  0xf8   :  { %v342_v37 = vmul.f32 1.442695, %v340_v41  ;;  %v532_v6 = vsub.f32 0.0, %v530_v22  ;;  %v886_v40 = vrot.slane %v885_v26, 1  ;;  %v718_v9 = vsub.f32 0.0, %v716_v45 }
  0xf9   :  { %v344_v36 = vmul.f32 1.442695, %v341_v31  ;;  %v899_v42 = vrot.slane %v898_v25, 1  ;;  %v533_v49 = vmul.f32 1.442695, %v531_v59  ;;  %vm350_vm1 = vcmp.ge.f32.partialorder %v1747_v21, 0.0 }
  0xfa   :  { %966 = vpow2.f32 %v342_v37  ;;  %v535_v50 = vmul.f32 1.442695, %v532_v6  ;;  %v887_v12 = vadd.f32 %v886_v40, %v885_v26  ;;  %v717_v44 = vand.u32 2147483647, %v1761_v62 }
  0xfb   :  { %968 = vpow2.f32 %v344_v36  ;;  %v900_v7 = vadd.f32 %v899_v42, %v898_v25  ;;  %v720_v11 = vmul.f32 1.442695, %v718_v9  ;;  %v1024_v2 = vmov 1966171168  }
  0xfc   :  { %970 = vpow2.f32 %v533_v49  ;;  %v1765_v16 = vadd.f32 %v887_v12, %v335_v1  ;;  %v719_v55 = vsub.f32 0.0, %v717_v44  ;;  %v360_v38 = vunpack.c.l.s4 %v1024_v2 }
  0xfd   :  { %v1767_v14 = vadd.f32 %v900_v7, %v335_v1  ;;  %972 = vpow2.f32 %v535_v50  ;;  %vm351_vm2 = vcmp.ge.f32.partialorder %v1749_v39, 0.0  ;;  %vm541_vm3 = vcmp.ge.f32.partialorder %v1753_v43, 0.0 }
  0xfe   :  { %v903_v5 = vand.u32 2147483647, %v1765_v16  ;;  %974 = vpow2.f32 %v720_v11  ;;  %v722_v23 = vmul.f32 1.442695, %v719_v55  ;;  %v361_v58 = vunpack.c.0.s8 %v360_v38 }
  0xff   :  { %v904_v63 = vand.u32 2147483647, %v1767_v14  ;;  %vm542_vm4 = vcmp.ge.f32.partialorder %v1755_v56, 0.0  ;;  %v1915_v36 = vlaneseq  ;;  %vm728_vm6 = vcmp.ge.f32.partialorder %v1759_v32, 0.0 }
 0x100   :  { %v905_v34 = vsub.f32 0.0, %v903_v5  ;;  %976 = vpow2.f32 %v722_v23  ;;  %v364_v17 = vsub.s32 %v361_v58, %v1914_v35  ;;  %vm729_vm7 = vcmp.ge.f32.partialorder %v1761_v62, 0.0 }
 0x101   :  { %v906_v0 = vsub.f32 0.0, %v904_v63  ;;  %vm1777_vm5 = vcmp.lt.s32.totalorder %v1915_v36, 256  ;;  %vm915_vm8 = vcmp.ge.f32.partialorder %v1765_v16, 0.0  ;;  %vm916_vm9 = vcmp.ge.f32.partialorder %v1767_v14, 0.0 }
 0x102   :  { %v907_v46 = vmul.f32 1.442695, %v905_v34 }
 0x103   :  { %v909_v8 = vmul.f32 1.442695, %v906_v0 }
 0x104   :  { %v967_v60 = vpop.eup %966 }
 0x105   :  { %v346_v13 = vadd.f32 1.0, %v967_v60  ;;  %v969_v4 = vpop.eup %968 }
 0x106   :  { %v347_v24 = vadd.f32 1.0, %v969_v4  ;;  %v971_v1 = vpop.eup %970 }
 0x107   :  { %978 = vrcp.f32 %v346_v13  ;;  %v973_v3 = vpop.eup %972  ;;  %v537_v10 = vadd.f32 1.0, %v971_v1 }
 0x108   :  { %980 = vpow2.f32 %v907_v46  ;;  %v538_v29 = vadd.f32 1.0, %v973_v3  ;;  %v975_v33 = vpop.eup %974 }
 0x109   :  { %982 = vrcp.f32 %v347_v24  ;;  %v724_v53 = vadd.f32 1.0, %v975_v33 }
 0x10a   :  { %984 = vpow2.f32 %v909_v8  ;;  %v977_v19 = vpop.eup %976 }
 0x10b   :  { %986 = vrcp.f32 %v537_v10  ;;  %v725_v57 = vadd.f32 1.0, %v977_v19 }
 0x10c   :  { %988 = vrcp.f32 %v538_v29 }
 0x10d   :  { %990 = vrcp.f32 %v724_v53 }
 0x10e   :  { %992 = vrcp.f32 %v725_v57 }
 0x111   :  { %v979_v48 = vpop.eup %978 }
 0x112   :  { %v981_v54 = vpop.eup %980  ;;  %v352_v30 = vmul.f32 %v979_v48, %v967_v60 }
 0x113   :  { %v983_v28 = vpop.eup %982  ;;  %v911_v20 = vadd.f32 1.0, %v981_v54 }
 0x114   :  { %v985_v18 = vpop.eup %984  ;;  %v353_v27 = vmul.f32 %v983_v28, %v969_v4  ;;  %v354_v61 = vsel %vm350_vm1, %v979_v48, %v352_v30 }
 0x115   :  { %v912_v41 = vadd.f32 1.0, %v985_v18  ;;  %994 = vrcp.f32 %v911_v20  ;;  %v987_v26 = vpop.eup %986 }
 0x116   :  { %v355_v15 = vsel %vm351_vm2, %v983_v28, %v353_v27  ;;  %v989_v25 = vpop.eup %988  ;;  %v543_v37 = vmul.f32 %v987_v26, %v971_v1 }
 0x117   :  { %v358_v31 = vcombine.low %v354_v61, %v355_v15  ;;  %996 = vrcp.f32 %v912_v41  ;;  %v544_v52 = vmul.f32 %v989_v25, %v973_v3  ;;  %v991_v21 = vpop.eup %990 }
 0x118   :  { %v545_v22 = vsel %vm541_vm3, %v987_v26, %v543_v37  ;;  %v730_v59 = vmul.f32 %v991_v21, %v975_v33  ;;  %v993_v6 = vpop.eup %992 }
 0x119   :  { %v365_v51 = vrot.slane %v358_v31, %v364_v17  ;;  %v546_v47 = vsel %vm542_vm4, %v989_v25, %v544_v52  ;;  %v731_v45 = vmul.f32 %v993_v6, %v977_v19 }
 0x11a   :  { %v549_v42 = vcombine.low %v545_v22, %v546_v47  ;;  %v732_v43 = vsel %vm728_vm6, %v991_v21, %v730_v59 }
 0x11b   :  { %v372_v40 = vrot.slane %v365_v51, %v364_v17  ;;  %v733_v56 = vsel %vm729_vm7, %v993_v6, %v731_v45 }
 0x11c   :  { %v556_v49 = vrot.slane %v549_v42, %v364_v17  ;;  %v736_v7 = vcombine.low %v732_v43, %v733_v56 }
 0x11d   :  { %378 = vst.msk [vmem:[#allocation3] sm:$0x3] %vm1777_vm5, %v372_v40 }
 0x11e   :  { %v563_v12 = vrot.slane %v556_v49, %v364_v17  ;;  %v743_v55 = vrot.slane %v736_v7, %v364_v17 }
 0x11f   :  { %v995_v50 = vpop.eup %994 }
 0x120   :  { %v917_v44 = vmul.f32 %v995_v50, %v981_v54  ;;  %565 = vst.msk [vmem:[#allocation3 + $0x2] sm:$0x3] %vm1777_vm5, %v563_v12  ;;  %v750_v5 = vrot.slane %v743_v55, %v364_v17 }
 0x121   :  { %v997_v9 = vpop.eup %996 }
 0x122   :  { %v918_v32 = vmul.f32 %v997_v9, %v985_v18  ;;  %v919_v11 = vsel %vm915_vm8, %v995_v50, %v917_v44  ;;  %752 = vst.msk [vmem:[#allocation3 + $0x4] sm:$0x3] %vm1777_vm5, %v750_v5 }
 0x124   :  { %v920_v63 = vsel %vm916_vm9, %v997_v9, %v918_v32 }
 0x125   :  { %v923_v62 = vcombine.low %v919_v11, %v920_v63 }
 0x127   :  { %v930_v23 = vrot.slane %v923_v62, %v364_v17 }
 0x129   :  { %v937_v34 = vrot.slane %v930_v23, %v364_v17 }
 0x12b   :  { %939 = vst.msk [vmem:[#allocation3 + $0x6] sm:$0x3] %vm1777_vm5, %v937_v34 }
 0x12c   :  { %1009 = shalt.err (!%p1006_p4)
}
 0x12d   :  { %s1010_s19 = scalar_lea.hbm %s1810_s5, 128 }
 0x12e   :  { %p1011_p5 = scmp.ne.s32.totalorder %s1810_s5, %s1010_s19  ;;  %p1014_p6 = scmp.lt.u32.totalorder %s1010_s19, %s1810_s5 }
 0x130   :  { %p1016_p7 = pnand %p1014_p6, %p1011_p5 }
 0x132   :  { %1019 = shalt.err (!%p1016_p7)
}
 0x133   :  { %949 = dma.vmem_to_hbm [thread:$0]  %s947_s15, 128, %s1810_s5, [#allocation4]  }
 0x134   :  { %1020 = dma.done.wait [#allocation4], 128  }
 0x135   :  { %1021 = vsyncadd [#allocation4], 4294967168 }
 0x136   :  { %953 = vsyncpa [#allocation4], 1 }

</bundles_post_ra>
